<compile_context>
chip_gen: v5e
topology: v5e:2x2
jax: 0.10.0
libtpu: 0.0.40
codegen_flags: <defaults>
</compile_context>

<pallas_src>
import functools
import math

import jax
import jax.numpy as jnp
from jax import lax
from jax.experimental import pallas as pl
from jax.experimental.pallas import tpu as pltpu


# ----------------------------------------------------------------------------
# Kernel: one (q-tile, kv-tile) step of the fused forward
# ----------------------------------------------------------------------------
def _flash_attention_kernel(
    q_ref,      # (tq, D)   f32 query tile (also the residual)
    k_ref,      # (tk, D)   f32 key tile
    v_ref,      # (tk, D)   f32 value tile
    wqk_ref,    # (2, D, kd)    [w_qs / sqrt(D), w_ks], compute dtype
    wvs_ref,    # (D, Dv)       value projection, compute dtype
    lnab_ref,   # (2, D)    f32 [a_2, b_2]
    o_ref,      # (tq, D)   f32 output tile (block index constant along kv axis)
    mq_sc,      # (tq, kd)  scratch: projected + scaled q, compute dtype
    m_sc,       # (tq, 1)   scratch: running row max, f32
    l_sc,       # (tq, 1)   scratch: running softmax denominator, f32
    acc_sc,     # (tq, Dv)  scratch: running numerator, f32
    *,
    eps,
    apply_ln,
    compute_dtype,
):
    ki = pl.program_id(1)

    @pl.when(ki == 0)
    def _init():
        # Project + scale Q once per q tile (1/sqrt(model_dim) already folded into w_qs).
        mq_sc[...] = jnp.dot(
            q_ref[...].astype(compute_dtype), wqk_ref[0],
            preferred_element_type=jnp.float32,
        ).astype(compute_dtype)
        m_sc[...] = jnp.full_like(m_sc, -jnp.inf)
        l_sc[...] = jnp.zeros_like(l_sc)
        acc_sc[...] = jnp.zeros_like(acc_sc)

    # K / V projections for this kv tile (bf16 MXU operands, f32 accumulation).
    mk = jnp.dot(k_ref[...].astype(compute_dtype), wqk_ref[1],
                 preferred_element_type=jnp.float32)                  # (tk, kd)
    mv = jnp.dot(v_ref[...].astype(compute_dtype), wvs_ref[...],
                 preferred_element_type=jnp.float32)                  # (tk, Dv)

    # Scores for this (q-tile, kv-tile) pair -- the full (L, L) matrix is never built.
    s = lax.dot_general(
        mq_sc[...], mk.astype(compute_dtype),
        (((1,), (1,)), ((), ())), preferred_element_type=jnp.float32,
    )                                                                 # (tq, tk)
    # TODO(synk): attention_mask (masked_fill -inf) not wired; reference default path is mask=None.

    # Online softmax update -- all element-wise math kept in f32 (VPU/EUP).
    m_prev = m_sc[...]
    m_new = jnp.maximum(m_prev, jnp.max(s, axis=-1, keepdims=True))
    alpha = jnp.exp(m_prev - m_new)
    p = jnp.exp(s - m_new)
    l_sc[...] = alpha * l_sc[...] + jnp.sum(p, axis=-1, keepdims=True)
    acc_sc[...] = alpha * acc_sc[...] + jnp.dot(
        p.astype(compute_dtype), mv.astype(compute_dtype),
        preferred_element_type=jnp.float32,
    )
    m_sc[...] = m_new

    @pl.when(ki == pl.num_programs(1) - 1)
    def _finalize():
        # Exact division (the approx EUP reciprocal previously pushed max-err past tolerance).
        attn_out = acc_sc[...] / l_sc[...]
        z = attn_out + q_ref[...]                    # residual; dropout == identity (eval)
        if apply_ln:
            d = z.shape[-1]
            mu = jnp.mean(z, axis=-1, keepdims=True)
            # torch.std is unbiased (divides by D-1); eps is added to sigma, not to variance.
            sigma = jnp.sqrt(
                jnp.sum((z - mu) ** 2, axis=-1, keepdims=True) * (1.0 / (d - 1)))
            z = (z - mu) / (sigma + eps) * lnab_ref[0] + lnab_ref[1]
        o_ref[...] = z.astype(o_ref.dtype)


# ----------------------------------------------------------------------------
# Wrapper
# ----------------------------------------------------------------------------
def one_head_attention_unit(q, k, v, w_qs, w_ks, w_vs, ln_a, ln_b, *,
                            eps=1e-3, block_q=None, block_k=None,
                            compute_dtype=jnp.bfloat16,
                            vmem_limit_bytes=32 * 1024 * 1024):
    L, model_dim = q.shape
    k_dim = w_qs.shape[1]
    v_dim = w_vs.shape[1]
    assert k.shape == (L, model_dim) and v.shape == (L, model_dim)
    assert w_qs.shape == (model_dim, k_dim) and w_ks.shape == (model_dim, k_dim)
    # The residual `attn_out + q` requires v_dim == model_dim (review correctness concern).
    assert v_dim == model_dim, "residual add requires v_dim == model_dim"

    block_q = L if block_q is None else block_q
    block_k = L if block_k is None else block_k
    assert L % block_q == 0 and L % block_k == 0
    assert block_q == L or block_q % 8 == 0
    assert block_k == L or block_k % 8 == 0
    n_q, n_k = L // block_q, L // block_k

    # Fold the 1/sqrt(model_dim) scale into w_qs; pack small params into fewer DMA inputs.
    w_qk = jnp.stack(
        [w_qs * (1.0 / math.sqrt(model_dim)), w_ks], axis=0
    ).astype(compute_dtype)                                            # (2, D, kd)
    w_vs_c = w_vs.astype(compute_dtype)                                # (D, Dv)
    ln_ab = jnp.stack(
        [jnp.reshape(ln_a, (model_dim,)), jnp.reshape(ln_b, (model_dim,))], axis=0
    ).astype(jnp.float32)                                              # (2, D)

    kern = functools.partial(
        _flash_attention_kernel,
        eps=eps,
        apply_ln=(model_dim != 1),    # LayerNormalization skips itself when model_dim == 1
        compute_dtype=compute_dtype,
    )

    bytes_cd = jnp.dtype(compute_dtype).itemsize
    cost = pl.CostEstimate(
        flops=int(2 * L * model_dim * k_dim                    # q projection (once per q tile)
                  + n_q * 2 * L * model_dim * (k_dim + v_dim)  # k/v projections, per q tile
                  + 2 * L * L * k_dim                          # scores
                  + 2 * L * L * v_dim),                        # p @ mv
        transcendentals=int(L * L + L * n_k + L),
        bytes_accessed=int(4 * L * model_dim * (2 + 2 * n_q)
                           + bytes_cd * (2 * model_dim * k_dim + model_dim * v_dim)
                           + 4 * 2 * model_dim),
    )

    grid_spec = pltpu.PrefetchScalarGridSpec(
        num_scalar_prefetch=0,
        grid=(n_q, n_k),
        in_specs=[
            pl.BlockSpec((block_q, model_dim), lambda qi, ki: (qi, 0)),     # q
            pl.BlockSpec((block_k, model_dim), lambda qi, ki: (ki, 0)),     # k
            pl.BlockSpec((block_k, model_dim), lambda qi, ki: (ki, 0)),     # v
            pl.BlockSpec((2, model_dim, k_dim), lambda qi, ki: (0, 0, 0)),  # [w_qs', w_ks]
            pl.BlockSpec((model_dim, v_dim), lambda qi, ki: (0, 0)),        # w_vs
            pl.BlockSpec((2, model_dim), lambda qi, ki: (0, 0)),            # [a_2, b_2]
        ],
        out_specs=pl.BlockSpec((block_q, model_dim), lambda qi, ki: (qi, 0)),
        scratch_shapes=[
            pltpu.VMEM((block_q, k_dim), compute_dtype),   # projected q
            pltpu.VMEM((block_q, 1), jnp.float32),         # running max
            pltpu.VMEM((block_q, 1), jnp.float32),         # running denominator
            pltpu.VMEM((block_q, v_dim), jnp.float32),     # running numerator
        ],
    )

    return pl.pallas_call(
        kern,
        out_shape=jax.ShapeDtypeStruct((L, model_dim), jnp.float32),
        grid_spec=grid_spec,
        compiler_params=pltpu.CompilerParams(
            dimension_semantics=("parallel", "arbitrary"),
            vmem_limit_bytes=vmem_limit_bytes,
        ),
        cost_estimate=cost,
    )(q, k, v, w_qk, w_vs_c, ln_ab)


# ----------------------------------------------------------------------------
# Pure-JAX reference (literal port of the PyTorch forward, eval mode, mask=None)
# ----------------------------------------------------------------------------
def one_head_attention_reference(q, k, v, w_qs, w_ks, w_vs, ln_a, ln_b, eps=1e-3):
    model_dim = q.shape[-1]
    mq = q @ w_qs
    mk = k @ w_ks
    mv = v @ w_vs
    att = jax.nn.softmax((mq @ mk.T) / math.sqrt(model_dim), axis=-1)
    z = att @ mv + q                              # dropout == identity (eval)
    if z.shape[1] == 1:                           # LayerNormalization skip branch
        return z
    mu = jnp.mean(z, axis=-1, keepdims=True)
    sigma = jnp.sqrt(jnp.sum((z - mu) ** 2, axis=-1, keepdims=True) / (z.shape[-1] - 1))
    return (z - mu) / (sigma + eps) * jnp.reshape(ln_a, (1, -1)) + jnp.reshape(ln_b, (1, -1))


# ----------------------------------------------------------------------------
# Main
# ----------------------------------------------------------------------------
if __name__ == "__main__":
    L = 64            # sequence length (rows of q/k/v); grid exercises 2x2 tiles
    model_dim = 32    # residual requires v_dim == model_dim
    k_dim = 16
    v_dim = 32

    key = jax.random.PRNGKey(0)
    kq, kk, kv_, kwq, kwk, kwv = jax.random.split(key, 6)

    q = jax.random.normal(kq, (L, model_dim), dtype=jnp.float32)
    k = jax.random.normal(kk, (L, model_dim), dtype=jnp.float32)
    v = jax.random.normal(kv_, (L, model_dim), dtype=jnp.float32)

    def xavier_normal(rng, fan_in, fan_out):
        std = math.sqrt(2.0 / (fan_in + fan_out))
        return (std * jax.random.normal(rng, (fan_in, fan_out))).astype(jnp.float32)

    w_qs = xavier_normal(kwq, model_dim, k_dim)
    w_ks = xavier_normal(kwk, model_dim, k_dim)
    w_vs = xavier_normal(kwv, model_dim, v_dim)
    ln_a = jnp.ones((model_dim,), jnp.float32)    # LayerNormalization a_2
    ln_b = jnp.zeros((model_dim,), jnp.float32)   # LayerNormalization b_2

    ref = one_head_attention_reference(q, k, v, w_qs, w_ks, w_vs, ln_a, ln_b, eps=1e-3)

    # f32 MXU-operand path: tight parity with the PyTorch forward (verifies kernel structure).
    out_f32 = one_head_attention_unit(
        q, k, v, w_qs, w_ks, w_vs, ln_a, ln_b,
        eps=1e-3, block_q=32, block_k=32, compute_dtype=jnp.float32)
    # bf16 MXU-operand path (production default per review): f32 accumulation, f32 elementwise.
    out_bf16 = one_head_attention_unit(
        q, k, v, w_qs, w_ks, w_vs, ln_a, ln_b,
        eps=1e-3, block_q=32, block_k=32, compute_dtype=jnp.bfloat16)
    out_f32, out_bf16 = jax.block_until_ready((out_f32, out_bf16))

    assert out_f32.shape == (L, model_dim) and out_bf16.shape == (L, model_dim)
    assert bool(jnp.all(jnp.isfinite(out_f32))) and bool(jnp.all(jnp.isfinite(out_bf16)))

    err_f32 = float(jnp.max(jnp.abs(out_f32 - ref)))
    err_bf16 = float(jnp.max(jnp.abs(out_bf16 - ref)))
    assert err_f32 < 1e-4, f"f32-path max abs err vs reference: {err_f32}"
    # bf16 operand rounding (with f32 accumulation) dominates this bound; elementwise math is f32.
    assert err_bf16 < 3e-2, f"bf16-path max abs err vs reference: {err_bf16}"

    print("KERNEL_OK")
</pallas_src>

<mosaic_0001>
module attributes {stable_mosaic.version = 11 : i64} {
  func.func @_flash_attention_kernel(%arg0: i32, %arg1: i32, %arg2: memref<32x32xf32, #tpu.memory_space<vmem>>, %arg3: memref<32x32xf32, #tpu.memory_space<vmem>>, %arg4: memref<32x32xf32, #tpu.memory_space<vmem>>, %arg5: memref<2x32x16xf32, #tpu.memory_space<vmem>>, %arg6: memref<32x32xf32, #tpu.memory_space<vmem>>, %arg7: memref<2x32xf32, #tpu.memory_space<vmem>>, %arg8: memref<32x32xf32, #tpu.memory_space<vmem>>, %arg9: memref<32x16xf32, #tpu.memory_space<vmem>>, %arg10: memref<32x1xf32, #tpu.memory_space<vmem>>, %arg11: memref<32x1xf32, #tpu.memory_space<vmem>>, %arg12: memref<32x32xf32, #tpu.memory_space<vmem>>) attributes {dimension_semantics = [#tpu.dimension_semantics<parallel>, #tpu.dimension_semantics<arbitrary>], iteration_bounds = array<i64: 2, 2>, scalar_prefetch = 0 : i64, scratch_operands = 4 : i64, tpu.core_type = #tpu.core_type<tc>, window_params = [{transform_indices = @transform_0, window_bounds = array<i64: 32, 32>}, {transform_indices = @transform_1, window_bounds = array<i64: 32, 32>}, {transform_indices = @transform_2, window_bounds = array<i64: 32, 32>}, {pipeline_mode = #tpu.pipeline_mode<synchronous>, transform_indices = @transform_3, window_bounds = array<i64: 2, 32, 16>}, {pipeline_mode = #tpu.pipeline_mode<synchronous>, transform_indices = @transform_4, window_bounds = array<i64: 32, 32>}, {pipeline_mode = #tpu.pipeline_mode<synchronous>, transform_indices = @transform_5, window_bounds = array<i64: 2, 32>}, {transform_indices = @transform_6, window_bounds = array<i64: 32, 32>}]} {
    %c0_i32 = arith.constant 0 : i32
    %0 = arith.cmpi eq, %arg1, %c0_i32 : i32
    %1 = arith.extui %0 : i1 to i32
    %c0_i32_0 = arith.constant 0 : i32
    %2 = arith.cmpi ne, %1, %c0_i32_0 : i32
    scf.if %2 {
      %c0_28 = arith.constant 0 : index
      %c0_29 = arith.constant 0 : index
      %37 = vector.load %arg2[%c0_28, %c0_29] : memref<32x32xf32, #tpu.memory_space<vmem>>, vector<32x32xf32>
      %c0_30 = arith.constant 0 : index
      %c0_31 = arith.constant 0 : index
      %c0_32 = arith.constant 0 : index
      %38 = vector.load %arg5[%c0_30, %c0_31, %c0_32] : memref<2x32x16xf32, #tpu.memory_space<vmem>>, vector<1x32x16xf32>
      %39 = vector.shape_cast %38 : vector<1x32x16xf32> to vector<32x16xf32>
      %cst_33 = arith.constant dense<0.000000e+00> : vector<32x16xf32>
      %40 = tpu.matmul %37, %39, %cst_33 {dimension_numbers = #tpu.dot_dimension_numbers<[1], [0], [0], [1], [0, 0, 1, 1], [], []>} : vector<32x32xf32>, vector<32x16xf32>, vector<32x16xf32> -> vector<32x16xf32>
      %c0_34 = arith.constant 0 : index
      %c0_35 = arith.constant 0 : index
      %41 = vector.load %arg9[%c0_34, %c0_35] : memref<32x16xf32, #tpu.memory_space<vmem>>, vector<32x16xf32>
      tpu.vector_store %arg9[%c0_34, %c0_35], %40 {strides = array<i32>} : memref<32x16xf32, #tpu.memory_space<vmem>>, vector<32x16xf32>,
      %cst_36 = arith.constant 0xFF800000 : f32
      %42 = vector.broadcast %cst_36 : f32 to vector<32x1xf32>
      %c0_37 = arith.constant 0 : index
      %c0_38 = arith.constant 0 : index
      %43 = vector.load %arg10[%c0_37, %c0_38] : memref<32x1xf32, #tpu.memory_space<vmem>>, vector<32x1xf32>
      tpu.vector_store %arg10[%c0_37, %c0_38], %42 {strides = array<i32>} : memref<32x1xf32, #tpu.memory_space<vmem>>, vector<32x1xf32>,
      %cst_39 = arith.constant 0.000000e+00 : f32
      %44 = vector.broadcast %cst_39 : f32 to vector<32x1xf32>
      %c0_40 = arith.constant 0 : index
      %c0_41 = arith.constant 0 : index
      %45 = vector.load %arg11[%c0_40, %c0_41] : memref<32x1xf32, #tpu.memory_space<vmem>>, vector<32x1xf32>
      tpu.vector_store %arg11[%c0_40, %c0_41], %44 {strides = array<i32>} : memref<32x1xf32, #tpu.memory_space<vmem>>, vector<32x1xf32>,
      %cst_42 = arith.constant 0.000000e+00 : f32
      %46 = vector.broadcast %cst_42 : f32 to vector<32x32xf32>
      %c0_43 = arith.constant 0 : index
      %c0_44 = arith.constant 0 : index
      %47 = vector.load %arg12[%c0_43, %c0_44] : memref<32x32xf32, #tpu.memory_space<vmem>>, vector<32x32xf32>
      tpu.vector_store %arg12[%c0_43, %c0_44], %46 {strides = array<i32>} : memref<32x32xf32, #tpu.memory_space<vmem>>, vector<32x32xf32>,
    } else {
    }
    %c0 = arith.constant 0 : index
    %c0_1 = arith.constant 0 : index
    %3 = vector.load %arg3[%c0, %c0_1] : memref<32x32xf32, #tpu.memory_space<vmem>>, vector<32x32xf32>
    %c1 = arith.constant 1 : index
    %c0_2 = arith.constant 0 : index
    %c0_3 = arith.constant 0 : index
    %4 = vector.load %arg5[%c1, %c0_2, %c0_3] : memref<2x32x16xf32, #tpu.memory_space<vmem>>, vector<1x32x16xf32>
    %5 = vector.shape_cast %4 : vector<1x32x16xf32> to vector<32x16xf32>
    %cst = arith.constant dense<0.000000e+00> : vector<32x16xf32>
    %6 = tpu.matmul %3, %5, %cst {dimension_numbers = #tpu.dot_dimension_numbers<[1], [0], [0], [1], [0, 0, 1, 1], [], []>} : vector<32x32xf32>, vector<32x16xf32>, vector<32x16xf32> -> vector<32x16xf32>
    %c0_4 = arith.constant 0 : index
    %c0_5 = arith.constant 0 : index
    %7 = vector.load %arg4[%c0_4, %c0_5] : memref<32x32xf32, #tpu.memory_space<vmem>>, vector<32x32xf32>
    %c0_6 = arith.constant 0 : index
    %c0_7 = arith.constant 0 : index
    %8 = vector.load %arg6[%c0_6, %c0_7] : memref<32x32xf32, #tpu.memory_space<vmem>>, vector<32x32xf32>
    %cst_8 = arith.constant dense<0.000000e+00> : vector<32x32xf32>
    %9 = tpu.matmul %7, %8, %cst_8 {dimension_numbers = #tpu.dot_dimension_numbers<[1], [0], [0], [1], [0, 0, 1, 1], [], []>} : vector<32x32xf32>, vector<32x32xf32>, vector<32x32xf32> -> vector<32x32xf32>
    %c0_9 = arith.constant 0 : index
    %c0_10 = arith.constant 0 : index
    %10 = vector.load %arg9[%c0_9, %c0_10] : memref<32x16xf32, #tpu.memory_space<vmem>>, vector<32x16xf32>
    %cst_11 = arith.constant dense<0.000000e+00> : vector<32x32xf32>
    %11 = tpu.matmul %10, %6, %cst_11 {dimension_numbers = #tpu.dot_dimension_numbers<[1], [1], [0], [0], [0, 0, 1, 0], [], []>} : vector<32x16xf32>, vector<32x16xf32>, vector<32x32xf32> -> vector<32x32xf32>
    %c0_12 = arith.constant 0 : index
    %c0_13 = arith.constant 0 : index
    %12 = vector.load %arg10[%c0_12, %c0_13] : memref<32x1xf32, #tpu.memory_space<vmem>>, vector<32x1xf32>
    %cst_14 = arith.constant dense<0xFF800000> : vector<32xf32>
    %13 = vector.multi_reduction <maximumf>, %11, %cst_14 [1] : vector<32x32xf32> to vector<32xf32>
    %14 = vector.shape_cast %13 : vector<32xf32> to vector<32x1xf32>
    %15 = arith.maximumf %12, %14 : vector<32x1xf32>
    %16 = arith.subf %12, %15 : vector<32x1xf32>
    %17 = math.exp %16 : vector<32x1xf32>
    %18 = vector.broadcast %15 : vector<32x1xf32> to vector<32x32xf32>
    %19 = arith.subf %11, %18 : vector<32x32xf32>
    %20 = math.exp %19 : vector<32x32xf32>
    %c0_15 = arith.constant 0 : index
    %c0_16 = arith.constant 0 : index
    %21 = vector.load %arg11[%c0_15, %c0_16] : memref<32x1xf32, #tpu.memory_space<vmem>>, vector<32x1xf32>
    %22 = arith.mulf %17, %21 : vector<32x1xf32>
    %cst_17 = arith.constant dense<0.000000e+00> : vector<32xf32>
    %23 = vector.multi_reduction <add>, %20, %cst_17 [1] : vector<32x32xf32> to vector<32xf32>
    %24 = vector.shape_cast %23 : vector<32xf32> to vector<32x1xf32>
    %25 = arith.addf %22, %24 : vector<32x1xf32>
    %c0_18 = arith.constant 0 : index
    %c0_19 = arith.constant 0 : index
    %26 = vector.load %arg11[%c0_18, %c0_19] : memref<32x1xf32, #tpu.memory_space<vmem>>, vector<32x1xf32>
    tpu.vector_store %arg11[%c0_18, %c0_19], %25 {strides = array<i32>} : memref<32x1xf32, #tpu.memory_space<vmem>>, vector<32x1xf32>,
    %c0_20 = arith.constant 0 : index
    %c0_21 = arith.constant 0 : index
    %27 = vector.load %arg12[%c0_20, %c0_21] : memref<32x32xf32, #tpu.memory_space<vmem>>, vector<32x32xf32>
    %28 = vector.broadcast %17 : vector<32x1xf32> to vector<32x32xf32>
    %29 = arith.mulf %28, %27 : vector<32x32xf32>
    %cst_22 = arith.constant dense<0.000000e+00> : vector<32x32xf32>
    %30 = tpu.matmul %20, %9, %cst_22 {dimension_numbers = #tpu.dot_dimension_numbers<[1], [0], [0], [1], [0, 0, 1, 1], [], []>} : vector<32x32xf32>, vector<32x32xf32>, vector<32x32xf32> -> vector<32x32xf32>
    %31 = arith.addf %29, %30 : vector<32x32xf32>
    %c0_23 = arith.constant 0 : index
    %c0_24 = arith.constant 0 : index
    %32 = vector.load %arg12[%c0_23, %c0_24] : memref<32x32xf32, #tpu.memory_space<vmem>>, vector<32x32xf32>
    tpu.vector_store %arg12[%c0_23, %c0_24], %31 {strides = array<i32>} : memref<32x32xf32, #tpu.memory_space<vmem>>, vector<32x32xf32>,
    %c0_25 = arith.constant 0 : index
    %c0_26 = arith.constant 0 : index
    %33 = vector.load %arg10[%c0_25, %c0_26] : memref<32x1xf32, #tpu.memory_space<vmem>>, vector<32x1xf32>
    tpu.vector_store %arg10[%c0_25, %c0_26], %15 {strides = array<i32>} : memref<32x1xf32, #tpu.memory_space<vmem>>, vector<32x1xf32>,
    %c1_i32 = arith.constant 1 : i32
    %34 = arith.cmpi eq, %arg1, %c1_i32 : i32
    %35 = arith.extui %34 : i1 to i32
    %c0_i32_27 = arith.constant 0 : i32
    %36 = arith.cmpi ne, %35, %c0_i32_27 : i32
    scf.if %36 {
      %c0_28 = arith.constant 0 : index
      %c0_29 = arith.constant 0 : index
      %37 = vector.load %arg12[%c0_28, %c0_29] : memref<32x32xf32, #tpu.memory_space<vmem>>, vector<32x32xf32>
      %c0_30 = arith.constant 0 : index
      %c0_31 = arith.constant 0 : index
      %38 = vector.load %arg11[%c0_30, %c0_31] : memref<32x1xf32, #tpu.memory_space<vmem>>, vector<32x1xf32>
      %39 = vector.broadcast %38 : vector<32x1xf32> to vector<32x32xf32>
      %40 = arith.divf %37, %39 : vector<32x32xf32>
      %c0_32 = arith.constant 0 : index
      %c0_33 = arith.constant 0 : index
      %41 = vector.load %arg2[%c0_32, %c0_33] : memref<32x32xf32, #tpu.memory_space<vmem>>, vector<32x32xf32>
      %42 = arith.addf %40, %41 : vector<32x32xf32>
      %cst_34 = arith.constant dense<0.000000e+00> : vector<32xf32>
      %43 = vector.multi_reduction <add>, %42, %cst_34 [1] : vector<32x32xf32> to vector<32xf32>
      %44 = vector.shape_cast %43 : vector<32xf32> to vector<32x1xf32>
      %cst_35 = arith.constant 3.200000e+01 : f32
      %45 = vector.broadcast %cst_35 : f32 to vector<32x1xf32>
      %46 = arith.divf %44, %45 : vector<32x1xf32>
      %47 = vector.broadcast %46 : vector<32x1xf32> to vector<32x32xf32>
      %48 = arith.subf %42, %47 : vector<32x32xf32>
      %49 = arith.mulf %48, %48 : vector<32x32xf32>
      %cst_36 = arith.constant dense<0.000000e+00> : vector<32xf32>
      %50 = vector.multi_reduction <add>, %49, %cst_36 [1] : vector<32x32xf32> to vector<32xf32>
      %51 = vector.shape_cast %50 : vector<32xf32> to vector<32x1xf32>
      %cst_37 = arith.constant 0.0322580636 : f32
      %52 = vector.broadcast %cst_37 : f32 to vector<32x1xf32>
      %53 = arith.mulf %51, %52 : vector<32x1xf32>
      %54 = math.sqrt %53 : vector<32x1xf32>
      %55 = vector.broadcast %46 : vector<32x1xf32> to vector<32x32xf32>
      %56 = arith.subf %42, %55 : vector<32x32xf32>
      %cst_38 = arith.constant 1.000000e-03 : f32
      %57 = vector.broadcast %cst_38 : f32 to vector<32x1xf32>
      %58 = arith.addf %54, %57 : vector<32x1xf32>
      %59 = vector.broadcast %58 : vector<32x1xf32> to vector<32x32xf32>
      %60 = arith.divf %56, %59 : vector<32x32xf32>
      %c0_39 = arith.constant 0 : index
      %c0_40 = arith.constant 0 : index
      %61 = vector.load %arg7[%c0_39, %c0_40] : memref<2x32xf32, #tpu.memory_space<vmem>>, vector<1x32xf32>
      %62 = vector.shape_cast %61 : vector<1x32xf32> to vector<32xf32>
      %63 = vector.shape_cast %62 : vector<32xf32> to vector<1x32xf32>
      %64 = vector.broadcast %63 : vector<1x32xf32> to vector<32x32xf32>
      %65 = arith.mulf %60, %64 : vector<32x32xf32>
      %c1_41 = arith.constant 1 : index
      %c0_42 = arith.constant 0 : index
      %66 = vector.load %arg7[%c1_41, %c0_42] : memref<2x32xf32, #tpu.memory_space<vmem>>, vector<1x32xf32>
      %67 = vector.shape_cast %66 : vector<1x32xf32> to vector<32xf32>
      %68 = vector.shape_cast %67 : vector<32xf32> to vector<1x32xf32>
      %69 = vector.broadcast %68 : vector<1x32xf32> to vector<32x32xf32>
      %70 = arith.addf %65, %69 : vector<32x32xf32>
      %c0_43 = arith.constant 0 : index
      %c0_44 = arith.constant 0 : index
      %71 = vector.load %arg8[%c0_43, %c0_44] : memref<32x32xf32, #tpu.memory_space<vmem>>, vector<32x32xf32>
      tpu.vector_store %arg8[%c0_43, %c0_44], %70 {strides = array<i32>} : memref<32x32xf32, #tpu.memory_space<vmem>>, vector<32x32xf32>,
    } else {
    }
    return
  }
  func.func @transform_0(%arg0: i32, %arg1: i32) -> (i32, i32) {
    %c0_i32 = arith.constant 0 : i32
    %c0_i32_0 = arith.constant 0 : i32
    return %arg0, %c0_i32 : i32, i32
  }
  func.func @transform_1(%arg0: i32, %arg1: i32) -> (i32, i32) {
    %c0_i32 = arith.constant 0 : i32
    %c0_i32_0 = arith.constant 0 : i32
    return %arg1, %c0_i32 : i32, i32
  }
  func.func @transform_2(%arg0: i32, %arg1: i32) -> (i32, i32) {
    %c0_i32 = arith.constant 0 : i32
    %c0_i32_0 = arith.constant 0 : i32
    return %arg1, %c0_i32 : i32, i32
  }
  func.func @transform_3(%arg0: i32, %arg1: i32) -> (i32, i32, i32) {
    %c0_i32 = arith.constant 0 : i32
    %c0_i32_0 = arith.constant 0 : i32
    %c0_i32_1 = arith.constant 0 : i32
    %c0_i32_2 = arith.constant 0 : i32
    return %c0_i32, %c0_i32_0, %c0_i32_1 : i32, i32, i32
  }
  func.func @transform_4(%arg0: i32, %arg1: i32) -> (i32, i32) {
    %c0_i32 = arith.constant 0 : i32
    %c0_i32_0 = arith.constant 0 : i32
    %c0_i32_1 = arith.constant 0 : i32
    return %c0_i32, %c0_i32_0 : i32, i32
  }
  func.func @transform_5(%arg0: i32, %arg1: i32) -> (i32, i32) {
    %c0_i32 = arith.constant 0 : i32
    %c0_i32_0 = arith.constant 0 : i32
    %c0_i32_1 = arith.constant 0 : i32
    return %c0_i32, %c0_i32_0 : i32, i32
  }
  func.func @transform_6(%arg0: i32, %arg1: i32) -> (i32, i32) {
    %c0_i32 = arith.constant 0 : i32
    %c0_i32_0 = arith.constant 0 : i32
    return %arg0, %c0_i32 : i32, i32
  }
}

</mosaic_0001>

<bundles_post_ra>
// kernel: tpu_custom_call.1
= control target key start
LH: loop header
LB: loop body
LE: loop exit
PB: predicated region body
PF: predicated region fallthrough
CT: control target
= control target key end

     0   :  { %s1313_s21 = smov 0   ;;  %s1315_s22 = smov 0   ;;  %s1592_s0 = inlined_call_operand.vmem [shape: f32[64,32], index: 0, kind: input, shape index: {}]   ;;  %s1593_s1 = inlined_call_operand.vmem [shape: f32[64,32], index: 1, kind: input, shape index: {}]   ;;  %s1594_s2 = inlined_call_operand.vmem [shape: f32[64,32], index: 2, kind: input, shape index: {}]   ;;  %s1595_s3 = inlined_call_operand.vmem [shape: f32[2,32,16], index: 3, kind: input, shape index: {}]   ;;  %s1596_s4 = inlined_call_operand.vmem [shape: f32[32,32], index: 4, kind: input, shape index: {}]   ;;  %s1597_s5 = inlined_call_operand.vmem [shape: f32[2,32], index: 5, kind: input, shape index: {}]   ;;  %s1598_s6 = inlined_call_operand.vmem [shape: f32[64,32], index: 6, kind: output, shape index: {}]  }
   0x1   :  { %s1317_s23 = smov 0   ;;  %s1319_s24 = smov 0  }
   0x2   :  { %s1321_s25 = smov 0  }
   0x3 LB: > { %s25_s26 = sadd.s32 1, %s1263_s23  ;;  %s28_s27 = sadd.s32 1, %s1267_s24  ;;  %s1271_s25 = sphi %s1321_s25, %s16_s25   ;;  %s1267_s24 = sphi %s1319_s24, %s1604_s24   ;;  %s1263_s23 = sphi %s1317_s23, %s1603_s23   ;;  %s1259_s22 = sphi %s1315_s22, %s1602_s22   ;;  %s1255_s21 = sphi %s1313_s21, %s1601_s21  }
   0x4   : > { %p26_p0 = scmp.ge.s32.totalorder %s25_s26, 2  ;;  %p1086_p1 = scmp.ge.s32.totalorder %s1271_s25, 1 }
   0x5   : > { %p247_p2 = scmp.lt.s32.totalorder %s1271_s25, 5 }
   0x6   : > { %s1606_s26 = smov (%p26_p0, %s25_s26), 0  ;;  %s1608_s27 = smov (!%p26_p0, %s28_s27), %s1267_s24 }
   0x7   : > { %p248_p3 = pnand %p1086_p1, %p247_p2  ;;  %p30_p4 = scmp.ge.s32.totalorder %s1608_s27, 2 }
   0x8   : > { %s1087_s28 = sshll.u32 (!%p248_p3), %s1259_s22, 2  ;;  %s1089_s29 = sshll.u32 (!%p248_p3), %s1255_s21, 2 }
   0x9   : > { %s1610_s27 = smov (%p30_p4, %s1608_s27), 0  ;;  %251 = sbr.rel (%p248_p3) target bundleno = 1326 (0x52e), region = 44 }
   0xa   : > { %p288_p5 = scmp.lt.s32.totalorder (!%p248_p3), %s1087_s28, 7  ;;  %p294_p6 = scmp.lt.s32.totalorder (!%p248_p3), %s1089_s29, 7 }
   0xb   : > { %p1095_p7 = scmp.ne.s32.totalorder (!%p248_p3), %s1255_s21, 0 }
   0xe   : > { %s1612_s28 = smov (!%p288_p5, %s1087_s28), 7  ;;  %s1614_s29 = smov (!%p294_p6, %s1089_s29), 7 }
   0xf   : > { %s1088_s30 = sshll.u32 %s1612_s28, 3  ;;  %s1090_s10 = sshll.u32 %s1614_s29, 3 }
  0x10   : > { %s1349_s9 = scalar_lea.vmem %s1592_s0, %s1088_s30  ;;  %s1354_s13 = scalar_lea.vmem %s1593_s1, %s1090_s10 }
  0x11   : > { %s1359_s16 = scalar_lea.vmem %s1594_s2, %s1090_s10  ;;  %s1364_s19 = scalar_lea.vmem %s1598_s6, %s1088_s30 }
  0x12   : > { %314 = sbr.rel (%p1095_p7) target bundleno = 165 (0xa5), region = 48 }
  0x17   : > { %v322_v0 = vld [vmem:[%s1595_s3 + $0x18] sm:$0xff]  ;;  %v321_v1 = vld [vmem:[%s1595_s3 + $0x10] sm:$0xff]  ;;  %vm370_vm0 = vcmask 7168   ;;  %v1273_v2 = vmov -inf   ;;  %v320_v3 = vld [vmem:[%s1595_s3 + $0x8] sm:$0xff]  ;;  %vm323_vm1 = vcmask 261120  }
  0x18   : > { %1128 = vmatpush.msra.mxu2 %v322_v0  ;;  %1129 = vmatpush.msra.mxu3 %v322_v0  ;;  %371 = vst.msk [vmem:[#allocation3] sm:$0xff] %vm370_vm0, %v1273_v2  ;;  %v319_v4 = vld [vmem:[%s1595_s3] sm:$0xff]  ;;  %v317_v5 = vld [vmem:[%s1349_s9 + $0x10] sm:$0xff]  ;;  %v1274_v6 = vmov 0.0   ;;  %v318_v7 = vld [vmem:[%s1349_s9 + $0x18] sm:$0xff]  ;;  %vm365_vm2 = vcmask 130048  }
  0x19   : > { %348 = vmatpush.msra.mxu0 %v322_v0  ;;  %1127 = vmatpush.msra.mxu1 %v322_v0  ;;  %372 = vst.msk [vmem:[#allocation3 + $0x8] sm:$0xff] %vm370_vm0, %v1273_v2  ;;  %v315_v8 = vld [vmem:[%s1349_s9] sm:$0xff]  ;;  %v316_v9 = vld [vmem:[%s1349_s9 + $0x8] sm:$0xff] }
  0x1a   : > { %1131 = vmatpush.msra.mxu2 %v321_v1  ;;  %1132 = vmatpush.msra.mxu3 %v321_v1  ;;  %373 = vst.msk [vmem:[#allocation3 + $0x10] sm:$0xff] %vm370_vm0, %v1273_v2 }
  0x1b   : > { %374 = vst.msk [vmem:[#allocation3 + $0x18] sm:$0xff] %vm370_vm0, %v1273_v2  ;;  %349 = vmatpush.msra.mxu0 %v321_v1  ;;  %1130 = vmatpush.msra.mxu1 %v321_v1 }
  0x1c   : > { %1134 = vmatpush.msra.mxu2 %v320_v3  ;;  %1135 = vmatpush.msra.mxu3 %v320_v3  ;;  %375 = vst.msk [vmem:[#allocation4] sm:$0xff] %vm370_vm0, %v1274_v6 }
  0x1d   : > { %376 = vst.msk [vmem:[#allocation4 + $0x8] sm:$0xff] %vm370_vm0, %v1274_v6  ;;  %350 = vmatpush.msra.mxu0 %v320_v3  ;;  %1133 = vmatpush.msra.mxu1 %v320_v3 }
  0x1e   : > { %1137 = vmatpush.msra.mxu2 %v319_v4  ;;  %1138 = vmatpush.msra.mxu3 %v319_v4  ;;  %377 = vst.msk [vmem:[#allocation4 + $0x10] sm:$0xff] %vm370_vm0, %v1274_v6 }
  0x1f   : > { %1098 = vmatmul.msk.f32.vlgmr.msra.gmra.mxu2 %vm323_vm1, %v317_v5  ;;  %378 = vst.msk [vmem:[#allocation4 + $0x18] sm:$0xff] %vm370_vm0, %v1274_v6  ;;  %1099 = vmatmul.msk.f32.vlgmr.msra.gmra.mxu3 %vm323_vm1, %v318_v7 }
  0x20   : > { %379 = vst.msk [vmem:[#allocation5] sm:$0xff] %vm323_vm1, %v1274_v6  ;;  %351 = vmatpush.msra.mxu0 %v319_v4  ;;  %1136 = vmatpush.msra.mxu1 %v319_v4 }
  0x21   : > { %380 = vst.msk [vmem:[#allocation5 + $0x8] sm:$0xff] %vm323_vm1, %v1274_v6  ;;  %1096 = vmatmul.msk.f32.vlgmr.msra.gmra.mxu0 %vm323_vm1, %v315_v8  ;;  %1097 = vmatmul.msk.f32.vlgmr.msra.gmra.mxu1 %vm323_vm1, %v316_v9 }
  0x22   : > { %381 = vst.msk [vmem:[#allocation5 + $0x10] sm:$0xff] %vm323_vm1, %v1274_v6 }
  0x23   : > { %382 = vst.msk [vmem:[#allocation5 + $0x18] sm:$0xff] %vm323_vm1, %v1274_v6 }
  0x9e   : > { %v353_v10 = vpop.f32.mrf.mxu0  ;;  %v356_v11 = vpop.f32.mrf.mxu1 }
  0x9f   : > { %366 = vst.msk [vmem:[#allocation2] sm:$0xff] %vm365_vm2, %v353_v10 }
  0xa0   : > { %367 = vst.msk [vmem:[#allocation2 + $0x8] sm:$0xff] %vm365_vm2, %v356_v11 }
  0xa2   : > { %v359_v12 = vpop.f32.mrf.mxu2  ;;  %v362_v13 = vpop.f32.mrf.mxu3 }
  0xa3   : > { %368 = vst.msk [vmem:[#allocation2 + $0x10] sm:$0xff] %vm365_vm2, %v359_v12 }
  0xa4   : > { %369 = vst.msk [vmem:[#allocation2 + $0x18] sm:$0xff] %vm365_vm2, %v362_v13 }
  0xa5 PF: > { %v1103_v14 = vld [vmem:[%s1595_s3 + $0x38] sm:$0xff]  ;;  %v1102_v15 = vld [vmem:[%s1595_s3 + $0x30] sm:$0xff]  ;;  %v1101_v16 = vld [vmem:[%s1595_s3 + $0x28] sm:$0xff]  ;;  %vm392_vm3 = vcmask 261120   ;;  %vm487_vm4 = vcmask 130048   ;;  %v1275_v46 = vmov 0  }
  0xa6   : > { %417 = vmatpush.msra.mxu0 %v1103_v14  ;;  %v1100_v17 = vld [vmem:[%s1595_s3 + $0x20] sm:$0xff]  ;;  %v384_v19 = vld [vmem:[%s1354_s13 + $0x8] sm:$0xff]  ;;  %v385_v20 = vld [vmem:[%s1354_s13 + $0x10] sm:$0xff]  ;;  %1184 = vset.pattern.permute.xlu2 %v1275_v46  ;;  %vm629_vm5 = vcmask 7168   ;;  %p1124_p8 = scmp.ne.s32.totalorder %s1255_s21, 1 }
  0xa7   : > { %v383_v18 = vld [vmem:[%s1354_s13] sm:$0xff]  ;;  %v386_v21 = vld [vmem:[%s1354_s13 + $0x18] sm:$0xff]  ;;  %v484_v27 = vld [vmem:[#allocation2 + $0x8] sm:$0xff]  ;;  %1185 = vset.pattern.permute.xlu0 %v1275_v46  ;;  %1186 = vset.pattern.permute.xlu1 %v1275_v46 }
  0xa8   : > { %418 = vmatpush.msra.mxu0 %v1102_v15  ;;  %v483_v26 = vld [vmem:[#allocation2] sm:$0xff]  ;;  %v441_v30 = vld [vmem:[%s1596_s4 + $0x18] sm:$0xff]  ;;  %v440_v31 = vld [vmem:[%s1596_s4 + $0x10] sm:$0xff] }
  0xa9   : > { %466 = vmatpush.msra.mxu1 %v441_v30  ;;  %v439_v32 = vld [vmem:[%s1596_s4 + $0x8] sm:$0xff]  ;;  %v438_v33 = vld [vmem:[%s1596_s4] sm:$0xff]  ;;  %v436_v40 = vld [vmem:[%s1359_s16 + $0x10] sm:$0xff] }
  0xaa   : > { %419 = vmatpush.msra.mxu0 %v1101_v16  ;;  %v485_v28 = vld [vmem:[#allocation2 + $0x10] sm:$0xff]  ;;  %v434_v34 = vld [vmem:[%s1359_s16] sm:$0xff]  ;;  %v435_v37 = vld [vmem:[%s1359_s16 + $0x8] sm:$0xff] }
  0xab   : > { %v486_v29 = vld [vmem:[#allocation2 + $0x18] sm:$0xff]  ;;  %467 = vmatpush.msra.mxu1 %v440_v31  ;;  %v541_v47 = vld [vmem:[#allocation3] sm:$0xff]  ;;  %v542_v50 = vld [vmem:[#allocation3 + $0x8] sm:$0xff] }
  0xac   : > { %420 = vmatpush.msra.mxu0 %v1100_v17  ;;  %v437_v43 = vld [vmem:[%s1359_s16 + $0x18] sm:$0xff]  ;;  %v543_v53 = vld [vmem:[#allocation3 + $0x10] sm:$0xff]  ;;  %v605_v31 = vld [vmem:[#allocation4] sm:$0xff] }
  0xad   : > { %1104 = vmatmul.msk.f32.vlgmr.msra.gmra.mxu0 %vm392_vm3, %v383_v18  ;;  %468 = vmatpush.msra.mxu1 %v439_v32  ;;  %v544_v60 = vld [vmem:[#allocation3 + $0x18] sm:$0xff] }
  0xaf   : > { %469 = vmatpush.msra.mxu1 %v438_v33 }
  0xb0   : > { %1108 = vmatmul.msk.f32.vlgmr.msra.gmra.mxu1 %vm392_vm3, %v434_v34 }
  0xb5   : > { %1105 = vmatmul.msk.f32.gmra.mxu0 %vm392_vm3, %v384_v19 }
  0xb8   : > { %1109 = vmatmul.msk.f32.gmra.mxu1 %vm392_vm3, %v435_v37 }
  0xbd   : > { %1106 = vmatmul.msk.f32.gmra.mxu0 %vm392_vm3, %v385_v20 }
  0xc0   : > { %1110 = vmatmul.msk.f32.gmra.mxu1 %vm392_vm3, %v436_v40  ;;  %v634_v40 = vld [vmem:[#allocation5] sm:$0xff] }
  0xc5   : > { %1107 = vmatmul.msk.f32.gmra.mxu0 %vm392_vm3, %v386_v21 }
  0xc8   : > { %1111 = vmatmul.msk.f32.gmra.mxu1 %vm392_vm3, %v437_v43 }
 0x12a   : > { %v422_v22 = vpop.f32.mrf.mxu0 }
 0x12d   : > { %v471_v57 = vpop.f32.mrf.mxu1 }
 0x132   : > { %v425_v23 = vpop.f32.mrf.mxu0 }
 0x135   : > { %v474_v0 = vpop.f32.mrf.mxu1 }
 0x13a   : > { %v428_v24 = vpop.f32.mrf.mxu0 }
 0x13d   : > { %v477_v5 = vpop.f32.mrf.mxu1 }
 0x142   : > { %v431_v25 = vpop.f32.mrf.mxu0 }
 0x143   : > { %1112 = vmatpush.xpose.msk.msra.mxu2 %vm487_vm4, %v431_v25 }
 0x145   : > { %v480_v9 = vpop.f32.mrf.mxu1 }
 0x146   : > { %686 = vmatpush.msra.mxu3 %v480_v9 }
 0x147   : > { %1113 = vmatpush.xpose.msk.msra.mxu2 %vm487_vm4, %v428_v24 }
 0x148   : > { %687 = vmatpush.msra.mxu3 %v477_v5 }
 0x14a   : > { %688 = vmatpush.msra.mxu3 %v474_v0 }
 0x14b   : > { %1114 = vmatpush.xpose.msk.msra.mxu2 %vm487_vm4, %v425_v23 }
 0x14c   : > { %689 = vmatpush.msra.mxu3 %v471_v57 }
 0x14f   : > { %1115 = vmatpush.xpose.msk.msra.mxu2 %vm487_vm4, %v422_v22 }
 0x152   : > { %1116 = vmatmul.msk.f32.vlgmr.msra.gmra.mxu2 %vm487_vm4, %v483_v26 }
 0x15a   : > { %1117 = vmatmul.msk.f32.gmra.mxu2 %vm487_vm4, %v484_v27 }
 0x162   : > { %1118 = vmatmul.msk.f32.gmra.mxu2 %vm487_vm4, %v485_v28 }
 0x16a   : > { %1119 = vmatmul.msk.f32.gmra.mxu2 %vm487_vm4, %v486_v29 }
 0x1d5   : > { %v1432_v35 = vpop.f32.mrf.mxu2 }
 0x1d6   : > { %v545_v36 = vsel %vm392_vm3, %v1432_v35, -inf }
 0x1d7   : > { %546 = vmax.xlane.f32.xlu0 %v545_v36 }
 0x1dd   : > { %v1438_v38 = vpop.f32.mrf.mxu2 }
 0x1de   : > { %v548_v39 = vsel %vm392_vm3, %v1438_v38, -inf }
 0x1df   : > { %549 = vmax.xlane.f32.xlu0 %v548_v39 }
 0x1e5   : > { %v1444_v41 = vpop.f32.mrf.mxu2 }
 0x1e6   : > { %v551_v42 = vsel %vm392_vm3, %v1444_v41, -inf }
 0x1e7   : > { %552 = vmax.xlane.f32.xlu1 %v551_v42 }
 0x1ed   : > { %v1450_v44 = vpop.f32.mrf.mxu2 }
 0x1ee   : > { %v554_v45 = vsel %vm392_vm3, %v1450_v44, -inf }
 0x1ef   : > { %555 = vmax.xlane.f32.xlu1 %v554_v45 }
 0x24a   : > { %v547_v48 = vpop.xlane.xlu0 %546 }
 0x24b   : > { %v557_v49 = vmax.f32 %v541_v47, %v547_v48 }
 0x24d   : > { %711 = vst.msk [vmem:[#allocation3] sm:$0xff] %vm629_vm5, %v557_v49  ;;  %575 = vperm.xlu2 %1184, %v557_v49   ;;  %v561_v58 = vsub.f32 %v541_v47, %v557_v49 }
 0x24f   : > { %v565_v61 = vmul.f32 1.442695, %v561_v58 }
 0x252   : > { %v550_v51 = vpop.xlane.xlu0 %549 }
 0x253   : > { %v558_v52 = vmax.f32 %v542_v50, %v550_v51 }
 0x255   : > { %712 = vst.msk [vmem:[#allocation3 + $0x8] sm:$0xff] %vm629_vm5, %v558_v52  ;;  %580 = vperm.xlu2 %1184, %v558_v52   ;;  %v562_v1 = vsub.f32 %v542_v50, %v558_v52  ;;  %v607_v50 = vld [vmem:[#allocation4 + $0x10] sm:$0xff] }
 0x257   : > { %v567_v3 = vmul.f32 1.442695, %v562_v1 }
 0x25a   : > { %v553_v54 = vpop.xlane.xlu1 %552 }
 0x25b   : > { %v559_v55 = vmax.f32 %v543_v53, %v553_v54 }
 0x25d   : > { %v563_v56 = vsub.f32 %v543_v53, %v559_v55  ;;  %713 = vst.msk [vmem:[#allocation3 + $0x10] sm:$0xff] %vm629_vm5, %v559_v55  ;;  %585 = vperm.xlu0 %1185, %v559_v55   ;;  %v608_v55 = vld [vmem:[#allocation4 + $0x18] sm:$0xff] }
 0x25f   : > { %v569_v59 = vmul.f32 1.442695, %v563_v56 }
 0x261   : > { %1187 = vpow2.f32 %v569_v59  ;;  %v636_v59 = vld [vmem:[#allocation5 + $0x10] sm:$0xff] }
 0x262   : > { %v556_v62 = vpop.xlane.xlu1 %555  ;;  %1189 = vpow2.f32 %v565_v61 }
 0x263   : > { %v560_v63 = vmax.f32 %v544_v60, %v556_v62  ;;  %1191 = vpow2.f32 %v567_v3 }
 0x265   : > { %714 = vst.msk [vmem:[#allocation3 + $0x18] sm:$0xff] %vm629_vm5, %v560_v63  ;;  %590 = vperm.xlu1 %1186, %v560_v63   ;;  %v564_v6 = vsub.f32 %v544_v60, %v560_v63  ;;  %v637_v63 = vld [vmem:[#allocation5 + $0x18] sm:$0xff] }
 0x267   : > { %v1459_v2 = vpop.eup %1187  ;;  %v571_v7 = vmul.f32 1.442695, %v564_v6 }
 0x268   : > { %650 = vperm.xlu0 %1185, %v1459_v2   ;;  %v1190_v4 = vpop.eup %1189  ;;  %v611_v51 = vmul.f32 %v1459_v2, %v607_v50 }
 0x269   : > { %v1192_v8 = vpop.eup %1191  ;;  %1193 = vpow2.f32 %v571_v7  ;;  %v609_v32 = vmul.f32 %v1190_v4, %v605_v31 }
 0x26d   : > { %640 = vperm.xlu1 %1186, %v1190_v4  }
 0x26f   : > { %v1462_v10 = vpop.eup %1193 }
 0x270   : > { %v612_v56 = vmul.f32 %v1462_v10, %v608_v55 }
 0x275   : > { %645 = vperm.xlu1 %1186, %v1192_v8  }
 0x27d   : > { %655 = vperm.xlu1 %1186, %v1462_v10  }
 0x2a7   : > { %v576_v11 = vpop.permute.xlu2 %575 }
 0x2a8   : > { %v593_v12 = vsub.f32 %v1432_v35, %v576_v11  ;;  %v606_v35 = vld [vmem:[#allocation4 + $0x8] sm:$0xff] }
 0x2a9   : > { %v610_v36 = vmul.f32 %v1192_v8, %v606_v35 }
 0x2aa   : > { %v597_v13 = vmul.f32 1.442695, %v593_v12 }
 0x2ac   : > { %1195 = vpow2.f32 %v597_v13 }
 0x2af   : > { %v581_v14 = vpop.permute.xlu2 %580 }
 0x2b0   : > { %v594_v15 = vsub.f32 %v1438_v38, %v581_v14 }
 0x2b2   : > { %v1196_v16 = vpop.eup %1195  ;;  %v599_v17 = vmul.f32 1.442695, %v594_v15 }
 0x2b3   : > { %1120 = vmatmul.msk.f32.vlgmr.msra.gmra.mxu3 %vm392_vm3, %v1196_v16  ;;  %v613_v18 = vsel %vm392_vm3, %v1196_v16, 0.0 }
 0x2b4   : > { %1197 = vpow2.f32 %v599_v17  ;;  %614 = vadd.xlane.f32.xlu2 %v613_v18 }
 0x2ba   : > { %v1198_v19 = vpop.eup %1197 }
 0x2bb   : > { %1121 = vmatmul.msk.f32.gmra.mxu3 %vm392_vm3, %v1198_v19  ;;  %v616_v20 = vsel %vm392_vm3, %v1198_v19, 0.0 }
 0x2bc   : > { %617 = vadd.xlane.f32.xlu2 %v616_v20 }
 0x2cf   : > { %v586_v21 = vpop.permute.xlu0 %585 }
 0x2d0   : > { %v595_v22 = vsub.f32 %v1444_v41, %v586_v21 }
 0x2d2   : > { %v601_v23 = vmul.f32 1.442695, %v595_v22 }
 0x2d4   : > { %1199 = vpow2.f32 %v601_v23 }
 0x2d7   : > { %v591_v24 = vpop.permute.xlu1 %590 }
 0x2d8   : > { %v596_v25 = vsub.f32 %v1450_v44, %v591_v24  ;;  %v635_v44 = vld [vmem:[#allocation5 + $0x8] sm:$0xff] }
 0x2da   : > { %v1200_v26 = vpop.eup %1199  ;;  %v603_v27 = vmul.f32 1.442695, %v596_v25  ;;  %v651_v49 = vpop.permute.xlu0 %650 }
 0x2db   : > { %1122 = vmatmul.msk.f32.gmra.mxu3 %vm392_vm3, %v1200_v26  ;;  %v619_v28 = vsel %vm392_vm3, %v1200_v26, 0.0  ;;  %v660_v60 = vmul.f32 %v651_v49, %v636_v59 }
 0x2dc   : > { %1201 = vpow2.f32 %v603_v27  ;;  %620 = vadd.xlane.f32.xlu0 %v619_v28 }
 0x2df   : > { %v641_v38 = vpop.permute.xlu1 %640 }
 0x2e0   : > { %v658_v41 = vmul.f32 %v641_v38, %v634_v40 }
 0x2e2   : > { %v1202_v29 = vpop.eup %1201 }
 0x2e3   : > { %1123 = vmatmul.msk.f32.gmra.mxu3 %vm392_vm3, %v1202_v29  ;;  %v622_v30 = vsel %vm392_vm3, %v1202_v29, 0.0 }
 0x2e4   : > { %623 = vadd.xlane.f32.xlu1 %v622_v30 }
 0x2e7   : > { %v646_v45 = vpop.permute.xlu1 %645 }
 0x2e8   : > { %v659_v46 = vmul.f32 %v646_v45, %v635_v44 }
 0x2ef   : > { %v656_v52 = vpop.permute.xlu1 %655 }
 0x2f0   : > { %v661_v0 = vmul.f32 %v656_v52, %v637_v63 }
 0x327   : > { %v615_v33 = vpop.xlane.xlu2 %614 }
 0x328   : > { %v625_v34 = vadd.f32 %v615_v33, %v609_v32 }
 0x32a   : > { %630 = vst.msk [vmem:[#allocation4] sm:$0xff] %vm629_vm5, %v625_v34 }
 0x32f   : > { %v618_v37 = vpop.xlane.xlu2 %617 }
 0x330   : > { %v626_v39 = vadd.f32 %v618_v37, %v610_v36 }
 0x332   : > { %631 = vst.msk [vmem:[#allocation4 + $0x8] sm:$0xff] %vm629_vm5, %v626_v39 }
 0x336   : > { %v691_v42 = vpop.f32.mrf.mxu3 }
 0x337   : > { %v703_v43 = vadd.f32 %v691_v42, %v658_v41 }
 0x339   : > { %707 = vst.msk [vmem:[#allocation5] sm:$0xff] %vm392_vm3, %v703_v43 }
 0x33e   : > { %v694_v47 = vpop.f32.mrf.mxu3 }
 0x33f   : > { %v704_v48 = vadd.f32 %v694_v47, %v659_v46 }
 0x341   : > { %708 = vst.msk [vmem:[#allocation5 + $0x8] sm:$0xff] %vm392_vm3, %v704_v48 }
 0x34f   : > { %v621_v53 = vpop.xlane.xlu0 %620 }
 0x350   : > { %v627_v54 = vadd.f32 %v621_v53, %v611_v51 }
 0x352   : > { %632 = vst.msk [vmem:[#allocation4 + $0x10] sm:$0xff] %vm629_vm5, %v627_v54 }
 0x357   : > { %v624_v57 = vpop.xlane.xlu1 %623 }
 0x358   : > { %v628_v58 = vadd.f32 %v624_v57, %v612_v56 }
 0x35a   : > { %633 = vst.msk [vmem:[#allocation4 + $0x18] sm:$0xff] %vm629_vm5, %v628_v58 }
 0x35e   : > { %v697_v61 = vpop.f32.mrf.mxu3 }
 0x35f   : > { %v705_v62 = vadd.f32 %v697_v61, %v660_v60 }
 0x361   : > { %709 = vst.msk [vmem:[#allocation5 + $0x10] sm:$0xff] %vm392_vm3, %v705_v62 }
 0x365   : > { %718 = sbr.rel (%p1124_p8) target bundleno = 1326 (0x52e), region = 52 }
 0x366   : > { %v700_v1 = vpop.f32.mrf.mxu3 }
 0x367   : > { %v706_v2 = vadd.f32 %v700_v1, %v661_v0 }
 0x369   : > { %710 = vst.msk [vmem:[#allocation5 + $0x18] sm:$0xff] %vm392_vm3, %v706_v2 }
 0x36a   : > { %v725_v3 = vld [vmem:[#allocation4 + $0x10] sm:$0xff]  ;;  %v723_v4 = vld [vmem:[#allocation4] sm:$0xff]  ;;  %v1276_v5 = vmov 0   ;;  %v726_v6 = vld [vmem:[#allocation4 + $0x18] sm:$0xff] }
 0x36b   : > { %1204 = vset.pattern.permute.xlu1 %v1276_v5  ;;  %1203 = vset.pattern.permute.xlu0 %v1276_v5  ;;  %v724_v7 = vld [vmem:[#allocation4 + $0x8] sm:$0xff]  ;;  %v721_v28 = vld [vmem:[#allocation5 + $0x10] sm:$0xff]  ;;  %v719_v34 = vld [vmem:[#allocation5] sm:$0xff] }
 0x36c   : > { %739 = vperm.xlu1 %1204, %v725_v3   ;;  %729 = vperm.xlu0 %1203, %v723_v4   ;;  %v809_v37 = vld [vmem:[%s1349_s9 + $0x10] sm:$0xff]  ;;  %v807_v42 = vld [vmem:[%s1349_s9] sm:$0xff]  ;;  %v720_v61 = vld [vmem:[#allocation5 + $0x8] sm:$0xff] }
 0x36d   : > { %v810_v63 = vld [vmem:[%s1349_s9 + $0x18] sm:$0xff]  ;;  %v808_v3 = vld [vmem:[%s1349_s9 + $0x8] sm:$0xff] }
 0x370   : > { %v722_v57 = vld [vmem:[#allocation5 + $0x18] sm:$0xff] }
 0x374   : > { %744 = vperm.xlu1 %1204, %v726_v6   ;;  %734 = vperm.xlu0 %1203, %v724_v7  }
 0x3de   : > { %v740_v8 = vpop.permute.xlu1 %739  ;;  %v730_v9 = vpop.permute.xlu0 %729 }
 0x3df   : > { %1207 = vrcp.f32 %v740_v8  ;;  %vm782_vm6 = vweird.f32 %v740_v8  ;;  %v788_v15 = vand.u32 2147483648, %v740_v8  ;;  %v786_v18 = vand.u32 2147483647, %v740_v8 }
 0x3e0   : > { %1209 = vrcp.f32 %v730_v9  ;;  %v758_v21 = vand.u32 2147483648, %v730_v9  ;;  %v756_v25 = vand.u32 2147483647, %v730_v9  ;;  %vm752_vm11 = vweird.f32 %v730_v9 }
 0x3e1   : > { %v789_v23 = vor.u32 1.1754944e-38, %v788_v15  ;;  %vm787_vm10 = vcmp.eq.f32.partialorder %v786_v18, 8.507059e+37 }
 0x3e2   : > { %v759_v31 = vor.u32 1.1754944e-38, %v758_v21  ;;  %vm757_vm13 = vcmp.eq.f32.partialorder %v756_v25, 8.507059e+37 }
 0x3e5   : > { %v1208_v10 = vpop.eup %1207 }
 0x3e6   : > { %v1210_v11 = vpop.eup %1209  ;;  %v778_v12 = vmul.f32 %v1208_v10, %v740_v8  ;;  %v1488_v13 = vpop.permute.xlu1 %744  ;;  %vm783_vm7 = vweird.f32 %v1208_v10 }
 0x3e7   : > { %v1490_v14 = vpop.permute.xlu0 %734  ;;  %v748_v16 = vmul.f32 %v1210_v11, %v730_v9  ;;  %1211 = vrcp.f32 %v1488_v13  ;;  %vm1494_vm8 = vmor %vm782_vm6, %vm783_vm7  ;;  %vm753_vm9 = vweird.f32 %v1210_v11  ;;  %vm797_vm14 = vweird.f32 %v1488_v13 }
 0x3e8   : > { %v779_v17 = vsub.f32 1.0, %v778_v12  ;;  %1213 = vrcp.f32 %v1490_v14  ;;  %vm754_vm12 = vmor %vm752_vm11, %vm753_vm9  ;;  %v803_v43 = vand.u32 2147483648, %v1488_v13  ;;  %v773_v45 = vand.u32 2147483648, %v1490_v14 }
 0x3e9   : > { %v749_v19 = vsub.f32 1.0, %v748_v16  ;;  %v801_v49 = vand.u32 2147483647, %v1488_v13  ;;  %v771_v52 = vand.u32 2147483647, %v1490_v14  ;;  %vm767_vm2 = vweird.f32 %v1490_v14 }
 0x3ea   : > { %v780_v20 = vmul.f32 %v1208_v10, %v779_v17  ;;  %v804_v55 = vor.u32 1.1754944e-38, %v803_v43  ;;  %v774_v59 = vor.u32 1.1754944e-38, %v773_v45  ;;  %v1277_v9 = vmov 32.0  }
 0x3eb   : > { %v750_v24 = vmul.f32 %v1210_v11, %v749_v19  ;;  %vm802_vm5 = vcmp.eq.f32.partialorder %v801_v49, 8.507059e+37  ;;  %vm772_vm6 = vcmp.eq.f32.partialorder %v771_v52, 8.507059e+37  ;;  %1215 = vrcp.f32 %v1277_v9 }
 0x3ec   : > { %v781_v26 = vadd.f32 %v1208_v10, %v780_v20 }
 0x3ed   : > { %v1212_v27 = vpop.eup %1211  ;;  %v751_v29 = vadd.f32 %v1210_v11, %v750_v24 }
 0x3ee   : > { %v1214_v30 = vpop.eup %1213  ;;  %v793_v32 = vmul.f32 %v1212_v27, %v1488_v13  ;;  %v785_v33 = vsel %vm1494_vm8, %v1208_v10, %v781_v26  ;;  %vm798_vm15 = vweird.f32 %v1212_v27 }
 0x3ef   : > { %v763_v35 = vmul.f32 %v1214_v30, %v1490_v14  ;;  %v790_v36 = vsel %vm787_vm10, %v789_v23, %v785_v33  ;;  %v755_v38 = vsel %vm754_vm12, %v1210_v11, %v751_v29  ;;  %vm768_vm0 = vweird.f32 %v1214_v30  ;;  %vm799_vm1 = vmor %vm797_vm14, %vm798_vm15 }
 0x3f0   : > { %v794_v39 = vsub.f32 1.0, %v793_v32  ;;  %v791_v40 = vmul.f32 %v790_v36, %v721_v28  ;;  %v760_v41 = vsel %vm757_vm13, %v759_v31, %v755_v38  ;;  %vm769_vm4 = vmor %vm767_vm2, %vm768_vm0 }
 0x3f1   : > { %v764_v44 = vsub.f32 1.0, %v763_v35  ;;  %v761_v46 = vmul.f32 %v760_v41, %v719_v34  ;;  %v1216_v10 = vpop.eup %1215 }
 0x3f2   : > { %v795_v47 = vmul.f32 %v1212_v27, %v794_v39  ;;  %v813_v48 = vadd.f32 %v809_v37, %v791_v40  ;;  %v828_v11 = vmul.f32 32.0, %v1216_v10  ;;  %vm832_vm7 = vweird.f32 %v1216_v10 }
 0x3f3   : > { %v765_v50 = vmul.f32 %v1214_v30, %v764_v44  ;;  %v811_v51 = vadd.f32 %v807_v42, %v761_v46 }
 0x3f4   : > { %v821_v53 = vsel %vm392_vm3, %v813_v48, 0.0  ;;  %v796_v54 = vadd.f32 %v1212_v27, %v795_v47  ;;  %v829_v12 = vsub.f32 1.0, %v828_v11 }
 0x3f5   : > { %822 = vadd.xlane.f32.xlu0 %v821_v53  ;;  %v815_v56 = vsel %vm392_vm3, %v811_v51, 0.0  ;;  %v766_v58 = vadd.f32 %v1214_v30, %v765_v50 }
 0x3f6   : > { %816 = vadd.xlane.f32.xlu2 %v815_v56  ;;  %v800_v60 = vsel %vm799_vm1, %v1212_v27, %v796_v54  ;;  %v830_v13 = vmul.f32 %v1216_v10, %v829_v12 }
 0x3f7   : > { %v805_v62 = vsel %vm802_vm5, %v804_v55, %v800_v60  ;;  %v770_v0 = vsel %vm769_vm4, %v1214_v30, %v766_v58 }
 0x3f8   : > { %v806_v1 = vmul.f32 %v805_v62, %v722_v57  ;;  %v775_v2 = vsel %vm772_vm6, %v774_v59, %v770_v0  ;;  %v831_v14 = vadd.f32 %v1216_v10, %v830_v13 }
 0x3f9   : > { %v776_v4 = vmul.f32 %v775_v2, %v720_v61 }
 0x3fa   : > { %v814_v5 = vadd.f32 %v810_v63, %v806_v1  ;;  %v833_v15 = vsel %vm832_vm7, %v1216_v10, %v831_v14 }
 0x3fb   : > { %v812_v6 = vadd.f32 %v808_v3, %v776_v4 }
 0x3fc   : > { %v824_v7 = vsel %vm392_vm3, %v814_v5, 0.0 }
 0x3fd   : > { %825 = vadd.xlane.f32.xlu1 %v824_v7  ;;  %v818_v8 = vsel %vm392_vm3, %v812_v6, 0.0 }
 0x3fe   : > { %819 = vadd.xlane.f32.xlu2 %v818_v8 }
 0x468   : > { %v823_v21 = vpop.xlane.xlu0 %822 }
 0x469   : > { %v817_v16 = vpop.xlane.xlu2 %816  ;;  %v836_v24 = vmul.f32 %v833_v15, %v823_v21 }
 0x46a   : > { %v834_v17 = vmul.f32 %v833_v15, %v817_v16 }
 0x46b   : > { %v1527_v27 = vsub.f32 %v813_v48, %v836_v24 }
 0x46c   : > { %v1518_v18 = vsub.f32 %v811_v51, %v834_v17 }
 0x46d   : > { %v844_v31 = vmul.f32 %v1527_v27, %v1527_v27 }
 0x46e   : > { %v842_v19 = vmul.f32 %v1518_v18, %v1518_v18 }
 0x46f   : > { %v852_v33 = vsel %vm392_vm3, %v844_v31, 0.0 }
 0x470   : > { %v846_v20 = vsel %vm392_vm3, %v842_v19, 0.0  ;;  %v826_v29 = vpop.xlane.xlu1 %825 }
 0x471   : > { %847 = vadd.xlane.f32.xlu2 %v846_v20  ;;  %v820_v22 = vpop.xlane.xlu2 %819  ;;  %v837_v30 = vmul.f32 %v833_v15, %v826_v29 }
 0x472   : > { %v835_v23 = vmul.f32 %v833_v15, %v820_v22 }
 0x473   : > { %v1532_v32 = vsub.f32 %v814_v5, %v837_v30 }
 0x474   : > { %v1523_v25 = vsub.f32 %v812_v6, %v835_v23 }
 0x475   : > { %v845_v34 = vmul.f32 %v1532_v32, %v1532_v32 }
 0x476   : > { %v843_v26 = vmul.f32 %v1523_v25, %v1523_v25 }
 0x477   : > { %v855_v35 = vsel %vm392_vm3, %v845_v34, 0.0 }
 0x478   : > { %v849_v28 = vsel %vm392_vm3, %v843_v26, 0.0 }
 0x479   : > { %850 = vadd.xlane.f32.xlu2 %v849_v28  ;;  %v1545_v28 = vld [vmem:[%s1597_s5] ss:$0 sm:$0xff] }
 0x481   : > { %853 = vadd.xlane.f32.xlu2 %v852_v33 }
 0x489   : > { %856 = vadd.xlane.f32.xlu2 %v855_v35  ;;  %v1550_v35 = vld [vmem:[%s1597_s5 + $0x1] ss:$0 sm:$0xff] }
 0x4e4   : > { %v848_v36 = vpop.xlane.xlu2 %847 }
 0x4e5   : > { %v858_v37 = vmul.f32 0.032258064, %v848_v36 }
 0x4e7   : > { %1217 = vrsqrt.f32 %v858_v37  ;;  %vm869_vm8 = vcmp.eq.f32.partialorder %v858_v37, inf  ;;  %v872_v52 = vand.u32 2147483648, %v858_v37  ;;  %vm871_vm9 = vcmp.eq.f32.partialorder %v858_v37, 0.0 }
 0x4ec   : > { %v851_v38 = vpop.xlane.xlu2 %850 }
 0x4ed   : > { %v1218_v39 = vpop.eup %1217  ;;  %v859_v40 = vmul.f32 0.032258064, %v851_v38 }
 0x4ee   : > { %v863_v41 = vmul.f32 %v1218_v39, %v858_v37 }
 0x4ef   : > { %1219 = vrsqrt.f32 %v859_v40  ;;  %vm881_vm10 = vcmp.eq.f32.partialorder %v859_v40, inf  ;;  %v884_v1 = vand.u32 2147483648, %v859_v40  ;;  %vm883_vm11 = vcmp.eq.f32.partialorder %v859_v40, 0.0 }
 0x4f0   : > { %v864_v42 = vmul.f32 %v1218_v39, %v863_v41 }
 0x4f2   : > { %v865_v43 = vmul.f32 0.5, %v864_v42 }
 0x4f4   : > { %v866_v44 = vsub.f32 1.5, %v865_v43  ;;  %v854_v45 = vpop.xlane.xlu2 %853 }
 0x4f5   : > { %v1220_v46 = vpop.eup %1219  ;;  %v860_v47 = vmul.f32 0.032258064, %v854_v45 }
 0x4f6   : > { %v867_v48 = vmul.f32 %v1218_v39, %v866_v44  ;;  %v875_v49 = vmul.f32 %v1220_v46, %v859_v40 }
 0x4f7   : > { %1221 = vrsqrt.f32 %v860_v47  ;;  %vm893_vm14 = vcmp.eq.f32.partialorder %v860_v47, inf  ;;  %v896_v21 = vand.u32 2147483648, %v860_v47  ;;  %vm895_vm0 = vcmp.eq.f32.partialorder %v860_v47, 0.0 }
 0x4f8   : > { %v868_v50 = vmul.f32 %v867_v48, %v858_v37  ;;  %v876_v51 = vmul.f32 %v1220_v46, %v875_v49 }
 0x4fa   : > { %v870_v53 = vsel %vm869_vm8, %v858_v37, %v868_v50  ;;  %v877_v54 = vmul.f32 0.5, %v876_v51 }
 0x4fb   : > { %v873_v55 = vsel %vm871_vm9, %v872_v52, %v870_v53 }
 0x4fc   : > { %v910_v56 = vadd.f32 0.001, %v873_v55  ;;  %v878_v57 = vsub.f32 1.5, %v877_v54  ;;  %v857_v58 = vpop.xlane.xlu2 %856 }
 0x4fd   : > { %v1222_v59 = vpop.eup %1221  ;;  %v1538_v60 = vmul.f32 0.032258064, %v857_v58 }
 0x4fe   : > { %1223 = vrcp.f32 %v910_v56  ;;  %v879_v61 = vmul.f32 %v1220_v46, %v878_v57  ;;  %v887_v62 = vmul.f32 %v1222_v59, %v860_v47  ;;  %v925_v12 = vand.u32 2147483648, %v910_v56 }
 0x4ff   : > { %1225 = vrsqrt.f32 %v1538_v60  ;;  %v923_v16 = vand.u32 2147483647, %v910_v56  ;;  %vm919_vm13 = vweird.f32 %v910_v56  ;;  %vm905_vm2 = vcmp.eq.f32.partialorder %v1538_v60, inf }
 0x500   : > { %v880_v63 = vmul.f32 %v879_v61, %v859_v40  ;;  %v888_v0 = vmul.f32 %v1222_v59, %v887_v62  ;;  %v926_v22 = vor.u32 1.1754944e-38, %v925_v12  ;;  %v908_v44 = vand.u32 2147483648, %v1538_v60 }
 0x501   : > { %vm924_vm1 = vcmp.eq.f32.partialorder %v923_v16, 8.507059e+37  ;;  %vm907_vm5 = vcmp.eq.f32.partialorder %v1538_v60, 0.0 }
 0x502   : > { %v882_v2 = vsel %vm881_vm10, %v859_v40, %v880_v63  ;;  %v889_v3 = vmul.f32 0.5, %v888_v0 }
 0x503   : > { %v885_v5 = vsel %vm883_vm11, %v884_v1, %v882_v2 }
 0x504   : > { %v1224_v4 = vpop.eup %1223  ;;  %v911_v8 = vadd.f32 0.001, %v885_v5  ;;  %v890_v9 = vsub.f32 1.5, %v889_v3 }
 0x505   : > { %v1226_v6 = vpop.eup %1225  ;;  %v915_v7 = vmul.f32 %v1224_v4, %v910_v56  ;;  %vm920_vm12 = vweird.f32 %v1224_v4 }
 0x506   : > { %v899_v10 = vmul.f32 %v1226_v6, %v1538_v60  ;;  %1227 = vrcp.f32 %v911_v8  ;;  %v891_v13 = vmul.f32 %v1222_v59, %v890_v9  ;;  %vm921_vm15 = vmor %vm919_vm13, %vm920_vm12  ;;  %v940_v40 = vand.u32 2147483648, %v911_v8 }
 0x507   : > { %v916_v11 = vsub.f32 1.0, %v915_v7  ;;  %v938_v43 = vand.u32 2147483647, %v911_v8  ;;  %vm934_vm6 = vweird.f32 %v911_v8 }
 0x508   : > { %v900_v14 = vmul.f32 %v1226_v6, %v899_v10  ;;  %v892_v17 = vmul.f32 %v891_v13, %v860_v47  ;;  %v941_v48 = vor.u32 1.1754944e-38, %v940_v40 }
 0x509   : > { %v917_v15 = vmul.f32 %v1224_v4, %v916_v11  ;;  %vm939_vm8 = vcmp.eq.f32.partialorder %v938_v43, 8.507059e+37 }
 0x50a   : > { %v901_v19 = vmul.f32 0.5, %v900_v14  ;;  %v894_v23 = vsel %vm893_vm14, %v860_v47, %v892_v17 }
 0x50b   : > { %v918_v20 = vadd.f32 %v1224_v4, %v917_v15  ;;  %v897_v30 = vsel %vm895_vm0, %v896_v21, %v894_v23 }
 0x50c   : > { %v902_v24 = vsub.f32 1.5, %v901_v19  ;;  %v1228_v26 = vpop.eup %1227  ;;  %v912_v34 = vadd.f32 0.001, %v897_v30 }
 0x50d   : > { %v922_v29 = vsel %vm921_vm15, %v1224_v4, %v918_v20  ;;  %v930_v33 = vmul.f32 %v1228_v26, %v911_v8  ;;  %vm935_vm4 = vweird.f32 %v1228_v26 }
 0x50e   : > { %v927_v31 = vsel %vm924_vm1, %v926_v22, %v922_v29  ;;  %v903_v37 = vmul.f32 %v1226_v6, %v902_v24  ;;  %1229 = vrcp.f32 %v912_v34  ;;  %vm936_vm7 = vmor %vm934_vm6, %vm935_vm4  ;;  %v955_v57 = vand.u32 2147483648, %v912_v34 }
 0x50f   : > { %v928_v36 = vmul.f32 %v927_v31, %v1518_v18  ;;  %v931_v38 = vsub.f32 1.0, %v930_v33  ;;  %v953_v59 = vand.u32 2147483647, %v912_v34  ;;  %vm949_vm10 = vweird.f32 %v912_v34 }
 0x510   : > { %v904_v41 = vmul.f32 %v903_v37, %v1538_v60  ;;  %v956_v63 = vor.u32 1.1754944e-38, %v955_v57 }
 0x511   : > { %v976_v39 = vmul.f32 %v1545_v28, %v928_v36  ;;  %v932_v42 = vmul.f32 %v1228_v26, %v931_v38  ;;  %vm954_vm12 = vcmp.eq.f32.partialorder %v953_v59, 8.507059e+37 }
 0x512   : > { %v906_v18 = vsel %vm905_vm2, %v1538_v60, %v904_v41 }
 0x513   : > { %v982_v45 = vadd.f32 %v1550_v35, %v976_v39  ;;  %v933_v46 = vadd.f32 %v1228_v26, %v932_v42  ;;  %v909_v47 = vsel %vm907_vm5, %v908_v44, %v906_v18 }
 0x514   : > { %v913_v49 = vadd.f32 0.001, %v909_v47  ;;  %v1230_v50 = vpop.eup %1229 }
 0x515   : > { %986 = vst.msk [vmem:[%s1364_s19] sm:$0xff] %vm392_vm3, %v982_v45  ;;  %v937_v51 = vsel %vm936_vm7, %v1228_v26, %v933_v46  ;;  %v945_v53 = vmul.f32 %v1230_v50, %v912_v34  ;;  %vm950_vm9 = vweird.f32 %v1230_v50 }
 0x516   : > { %v942_v52 = vsel %vm939_vm8, %v941_v48, %v937_v51  ;;  %1231 = vrcp.f32 %v913_v49  ;;  %vm951_vm11 = vmor %vm949_vm10, %vm950_vm9  ;;  %v970_v4 = vand.u32 2147483648, %v913_v49  ;;  %v968_v6 = vand.u32 2147483647, %v913_v49 }
 0x517   : > { %v943_v54 = vmul.f32 %v942_v52, %v1523_v25  ;;  %v946_v55 = vsub.f32 1.0, %v945_v53  ;;  %vm964_vm14 = vweird.f32 %v913_v49 }
 0x518   : > { %v971_v10 = vor.u32 1.1754944e-38, %v970_v4  ;;  %vm969_vm0 = vcmp.eq.f32.partialorder %v968_v6, 8.507059e+37 }
 0x519   : > { %v977_v56 = vmul.f32 %v1545_v28, %v943_v54  ;;  %v947_v58 = vmul.f32 %v1230_v50, %v946_v55 }
 0x51b   : > { %v983_v60 = vadd.f32 %v1550_v35, %v977_v56  ;;  %v948_v62 = vadd.f32 %v1230_v50, %v947_v58 }
 0x51c   : > { %v1232_v61 = vpop.eup %1231 }
 0x51d   : > { %987 = vst.msk [vmem:[%s1364_s19 + $0x8] sm:$0xff] %vm392_vm3, %v983_v60  ;;  %v960_v0 = vmul.f32 %v1232_v61, %v913_v49  ;;  %v952_v1 = vsel %vm951_vm11, %v1230_v50, %v948_v62  ;;  %vm965_vm13 = vweird.f32 %v1232_v61 }
 0x51e   : > { %v957_v25 = vsel %vm954_vm12, %v956_v63, %v952_v1  ;;  %vm966_vm15 = vmor %vm964_vm14, %vm965_vm13 }
 0x51f   : > { %v961_v2 = vsub.f32 1.0, %v960_v0  ;;  %v958_v3 = vmul.f32 %v957_v25, %v1527_v27 }
 0x521   : > { %v962_v5 = vmul.f32 %v1232_v61, %v961_v2  ;;  %v978_v7 = vmul.f32 %v1545_v28, %v958_v3 }
 0x523   : > { %v963_v8 = vadd.f32 %v1232_v61, %v962_v5  ;;  %v984_v9 = vadd.f32 %v1550_v35, %v978_v7 }
 0x525   : > { %v967_v11 = vsel %vm966_vm15, %v1232_v61, %v963_v8  ;;  %988 = vst.msk [vmem:[%s1364_s19 + $0x10] sm:$0xff] %vm392_vm3, %v984_v9 }
 0x526   : > { %v972_v12 = vsel %vm969_vm0, %v971_v10, %v967_v11 }
 0x527   : > { %v973_v27 = vmul.f32 %v972_v12, %v1532_v32 }
 0x529   : > { %v979_v13 = vmul.f32 %v1545_v28, %v973_v27 }
 0x52b   : > { %v985_v14 = vadd.f32 %v1550_v35, %v979_v13 }
 0x52d   : > { %989 = vst.msk [vmem:[%s1364_s19 + $0x18] sm:$0xff] %vm392_vm3, %v985_v14 }
 0x52e PF: > { %s16_s25 = sadd.s32 1, %s1271_s25   ;;  %s1601_s21 = smov %s1263_s23 }
 0x52f   : > { %p13_p9 = scmp.ge.s32.totalorder %s16_s25, 6   ;;  %s1602_s22 = smov %s1267_s24 }
 0x530   : > { %s1603_s23 = smov %s1606_s26  ;;  %s1604_s24 = smov %s1610_s27 }
 0x531   :  { %15 = sbr.rel (!%p13_p9) target bundleno = 3 (0x3), region = 89 }

</bundles_post_ra>
